<compile_context>
chip_gen: v7x
topology: tpu7x:2x2x1
jax: 0.10.0
libtpu: 0.0.40
codegen_flags: <defaults>
</compile_context>

<pallas_src>
import jax
import jax.numpy as jnp
from jax.experimental import pallas as pl
from jax.experimental.pallas import tpu as pltpu

GAMMA = 5.0                          # FocalLoss default
N_CLASSES = 12                       # UnionMinusIntesectionLoss default n_classes
UI_TARGET_SHAPE = (12, 512, 512)     # module default target_shape (fixes UILossweight)
UI_LOSS_WEIGHT = 1.0 / (UI_TARGET_SHAPE[1] * UI_TARGET_SHAPE[2] / N_CLASSES)
SMOOTH = 1e-6                        # cancels exactly in (union + S) - (inter + S)

MAX_TILE_PIXELS = 32768              # ~1.5 MiB f32 logits per buffer (fits all chips)


def _combined_loss_kernel(logits_ref, target_ref, acc_ref):
    """Per-tile fused focal + union-minus-intersection partial sums.

    logits_ref: (1, C, TILE_S)  logits tile, class dim on sublanes, pixels on lanes
    target_ref: (1, 1, TILE_S)  int32 labels, lane-dense
    acc_ref:    (1, 1, 2, TILE_S) f32 lane-dense partial sums
                [.., 0, :] focal numerator, [.., 1, :] (union - inter) numerator;
                resident across the inner (spatial) grid axis.
    """
    @pl.when(pl.program_id(2) == 0)
    def _init():
        acc_ref[...] = jnp.zeros_like(acc_ref)

    x = logits_ref[0].astype(jnp.float32)              # (C, TILE_S) f32
    t = target_ref[0]                                  # (1, TILE_S) int32

    # numerically-stable log-sum-exp over the class (sublane) axis
    m = jnp.max(x, axis=0, keepdims=True)              # (1, TILE_S)
    lse = jnp.log(jnp.sum(jnp.exp(x - m), axis=0, keepdims=True)) + m

    # logit of the target class via iota-compare + sublane reduce (no full one-hot pass)
    class_ids = jax.lax.broadcasted_iota(jnp.int32, x.shape, 0)
    x_t = jnp.sum(jnp.where(class_ids == t, x, 0.0), axis=0, keepdims=True)

    log_p_t = x_t - lse                                # (1, TILE_S)
    p_t = jnp.exp(log_p_t)
    omp = 1.0 - p_t

    # FocalLoss per-pixel term: -(1 - p_t)^5 * log p_t        (gamma = 5.0)
    focal = -((omp * omp) ** 2 * omp) * log_p_t
    # UnionMinusIntersection per-pixel term:
    #   sum_c (p + onehot - 2 p onehot) = 2 (1 - p_t)          (SMOOTH cancels exactly)
    ui = 2.0 * omp

    acc_ref[0, 0, 0:1, :] += focal
    acc_ref[0, 0, 1:2, :] += ui


def _pick_tile(spatial, max_tile=MAX_TILE_PIXELS):
    """Largest multiple of 128 that divides `spatial`, capped at max_tile."""
    best = None
    for t in range(128, min(spatial, max_tile) + 1, 128):
        if spatial % t == 0:
            best = t
    if best is None:
        # TODO(synk): tail-masked grid for spatial sizes with no 128-multiple divisor.
        best = spatial
    return best


@jax.jit
def combined_focal_and_ui_loss(inputs, target):
    """inputs: (N, C, H, W) logits (NCHW, like PyTorch); target: (N, H, W) int labels."""
    N, C, H, W = inputs.shape
    S = H * W
    P = N * S

    # Free views only: no HBM transpose, no dtype cast (bf16 inputs stay bf16).
    logits3d = inputs.reshape(N, C, S)
    target3d = target.reshape(N, 1, S).astype(jnp.int32)

    tile_s = _pick_tile(S)
    n_tiles = S // tile_s
    nsplit = 2 if (n_tiles % 2 == 0) else 1            # parallel axis for v7x's 2nd TC
    inner = n_tiles // nsplit

    partials = pl.pallas_call(
        _combined_loss_kernel,
        out_shape=jax.ShapeDtypeStruct((N, nsplit, 2, tile_s), jnp.float32),
        grid_spec=pltpu.PrefetchScalarGridSpec(
            num_scalar_prefetch=0,
            grid=(N, nsplit, inner),
            in_specs=[
                pl.BlockSpec((1, C, tile_s), lambda n, o, s: (n, 0, o * inner + s)),
                pl.BlockSpec((1, 1, tile_s), lambda n, o, s: (n, 0, o * inner + s)),
            ],
            out_specs=pl.BlockSpec((1, 1, 2, tile_s), lambda n, o, s: (n, o, 0, 0)),
        ),
        compiler_params=pltpu.CompilerParams(
            dimension_semantics=("parallel", "parallel", "arbitrary"),
            vmem_limit_bytes=48 * 1024 * 1024,
        ),
    )(logits3d, target3d)

    focal_sum = jnp.sum(partials[:, :, 0, :])
    ui_sum = jnp.sum(partials[:, :, 1, :])

    focal_loss = focal_sum / jnp.float32(P)                            # nll_loss 'mean'
    # UILossweight mirrors the module's constructor default target_shape, as in PyTorch.
    ui_loss = (ui_sum / jnp.float32(N * C)) * jnp.float32(UI_LOSS_WEIGHT)
    return focal_loss + ui_loss


def _reference_loss(inputs, target):
    """Pure-JAX reference mirroring the PyTorch forward."""
    N, C, H, W = inputs.shape
    x = inputs.astype(jnp.float32)
    log_prob = jax.nn.log_softmax(x, axis=1)
    prob = jnp.exp(log_prob)
    onehot = jax.nn.one_hot(target, C, axis=1, dtype=jnp.float32)      # (N, C, H, W)

    one_minus_p = 1.0 - prob
    focal_w = (one_minus_p * one_minus_p) ** 2 * one_minus_p
    focal = -jnp.mean(jnp.sum(onehot * focal_w * log_prob, axis=1))

    sm = jax.nn.softmax(x, axis=1)
    inter = jnp.sum((sm * onehot).reshape(N, C, -1), axis=2) + SMOOTH
    union = jnp.sum((sm + onehot - sm * onehot).reshape(N, C, -1), axis=2) + SMOOTH
    ui = jnp.mean(union - inter) * UI_LOSS_WEIGHT
    return focal + ui


if __name__ == "__main__":
    key = jax.random.PRNGKey(0)
    k_logits, k_target = jax.random.split(key)

    N, C, H, W = 2, N_CLASSES, 16, 16      # C must equal 12 (module default n_classes)
    inputs = jax.random.normal(k_logits, (N, C, H, W), dtype=jnp.float32)
    target = jax.random.randint(k_target, (N, H, W), 0, C, dtype=jnp.int32)

    out = combined_focal_and_ui_loss(inputs, target)
    out = jax.block_until_ready(out)

    ref = jax.block_until_ready(_reference_loss(inputs, target))
    assert jnp.allclose(out, ref, rtol=1e-4, atol=1e-5), (out, ref)

    print("KERNEL_OK")
</pallas_src>

<mosaic_0001>
module attributes {stable_mosaic.version = 11 : i64} {
  func.func @_combined_loss_kernel(%arg0: i32, %arg1: i32, %arg2: i32, %arg3: memref<1x12x256xf32, #tpu.memory_space<vmem>>, %arg4: memref<1x1x256xi32, #tpu.memory_space<vmem>>, %arg5: memref<1x1x2x256xf32, #tpu.memory_space<vmem>>) attributes {dimension_semantics = [#tpu.dimension_semantics<parallel>, #tpu.dimension_semantics<parallel>, #tpu.dimension_semantics<arbitrary>], iteration_bounds = array<i64: 2, 1, 1>, scalar_prefetch = 0 : i64, scratch_operands = 0 : i64, tpu.core_type = #tpu.core_type<tc>, window_params = [{transform_indices = @transform_0, window_bounds = array<i64: 1, 12, 256>}, {transform_indices = @transform_1, window_bounds = array<i64: 1, 1, 256>}, {transform_indices = @transform_2, window_bounds = array<i64: 1, 1, 2, 256>}]} {
    %c0_i32 = arith.constant 0 : i32
    %0 = arith.cmpi eq, %arg2, %c0_i32 : i32
    %1 = arith.extui %0 : i1 to i32
    %c0_i32_0 = arith.constant 0 : i32
    %2 = arith.cmpi ne, %1, %c0_i32_0 : i32
    scf.if %2 {
      %cst_27 = arith.constant 0.000000e+00 : f32
      %47 = vector.broadcast %cst_27 : f32 to vector<1x1x2x256xf32>
      %c0_28 = arith.constant 0 : index
      %c0_29 = arith.constant 0 : index
      %c0_30 = arith.constant 0 : index
      %c0_31 = arith.constant 0 : index
      %48 = vector.load %arg5[%c0_28, %c0_29, %c0_30, %c0_31] : memref<1x1x2x256xf32, #tpu.memory_space<vmem>>, vector<1x1x2x256xf32>
      tpu.vector_store %arg5[%c0_28, %c0_29, %c0_30, %c0_31], %47 {strides = array<i32>} : memref<1x1x2x256xf32, #tpu.memory_space<vmem>>, vector<1x1x2x256xf32>,
    } else {
    }
    %c0 = arith.constant 0 : index
    %c0_1 = arith.constant 0 : index
    %c0_2 = arith.constant 0 : index
    %3 = vector.load %arg3[%c0, %c0_1, %c0_2] : memref<1x12x256xf32, #tpu.memory_space<vmem>>, vector<1x12x256xf32>
    %4 = vector.shape_cast %3 : vector<1x12x256xf32> to vector<12x256xf32>
    %c0_3 = arith.constant 0 : index
    %c0_4 = arith.constant 0 : index
    %c0_5 = arith.constant 0 : index
    %5 = vector.load %arg4[%c0_3, %c0_4, %c0_5] : memref<1x1x256xi32, #tpu.memory_space<vmem>>, vector<1x1x256xi32>
    %6 = vector.shape_cast %5 : vector<1x1x256xi32> to vector<1x256xi32>
    %cst = arith.constant dense<0xFF800000> : vector<256xf32>
    %7 = vector.multi_reduction <maximumf>, %4, %cst [0] : vector<12x256xf32> to vector<256xf32>
    %8 = vector.shape_cast %7 : vector<256xf32> to vector<1x256xf32>
    %9 = vector.broadcast %8 : vector<1x256xf32> to vector<12x256xf32>
    %10 = arith.subf %4, %9 : vector<12x256xf32>
    %11 = math.exp %10 : vector<12x256xf32>
    %cst_6 = arith.constant dense<0.000000e+00> : vector<256xf32>
    %12 = vector.multi_reduction <add>, %11, %cst_6 [0] : vector<12x256xf32> to vector<256xf32>
    %13 = vector.shape_cast %12 : vector<256xf32> to vector<1x256xf32>
    %14 = math.log %13 : vector<1x256xf32>
    %15 = arith.addf %14, %8 : vector<1x256xf32>
    %16 = tpu.iota {dimensions = array<i32: 0>} : vector<12x256xi32>
    %17 = vector.broadcast %6 : vector<1x256xi32> to vector<12x256xi32>
    %18 = arith.cmpi eq, %16, %17 : vector<12x256xi32>
    %cst_7 = arith.constant 0.000000e+00 : f32
    %19 = vector.broadcast %cst_7 : f32 to vector<12x256xf32>
    %20 = arith.select %18, %4, %19 : vector<12x256xi1>, vector<12x256xf32>
    %cst_8 = arith.constant dense<0.000000e+00> : vector<256xf32>
    %21 = vector.multi_reduction <add>, %20, %cst_8 [0] : vector<12x256xf32> to vector<256xf32>
    %22 = vector.shape_cast %21 : vector<256xf32> to vector<1x256xf32>
    %23 = arith.subf %22, %15 : vector<1x256xf32>
    %24 = math.exp %23 : vector<1x256xf32>
    %cst_9 = arith.constant 1.000000e+00 : f32
    %25 = vector.broadcast %cst_9 : f32 to vector<1x256xf32>
    %26 = arith.subf %25, %24 : vector<1x256xf32>
    %27 = arith.mulf %26, %26 : vector<1x256xf32>
    %28 = arith.mulf %27, %27 : vector<1x256xf32>
    %29 = arith.mulf %28, %26 : vector<1x256xf32>
    %cst_10 = arith.constant 0.000000e+00 : f32
    %30 = vector.broadcast %cst_10 : f32 to vector<1x256xf32>
    %31 = arith.subf %30, %29 : vector<1x256xf32>
    %32 = arith.mulf %31, %23 : vector<1x256xf32>
    %cst_11 = arith.constant 2.000000e+00 : f32
    %33 = vector.broadcast %cst_11 : f32 to vector<1x256xf32>
    %34 = arith.mulf %33, %26 : vector<1x256xf32>
    %c0_12 = arith.constant 0 : index
    %c0_13 = arith.constant 0 : index
    %c0_14 = arith.constant 0 : index
    %c0_15 = arith.constant 0 : index
    %35 = vector.load %arg5[%c0_12, %c0_13, %c0_14, %c0_15] : memref<1x1x2x256xf32, #tpu.memory_space<vmem>>, vector<1x1x1x256xf32>
    %36 = vector.shape_cast %35 : vector<1x1x1x256xf32> to vector<1x256xf32>
    %37 = arith.addf %36, %32 : vector<1x256xf32>
    %c0_16 = arith.constant 0 : index
    %c0_17 = arith.constant 0 : index
    %c0_18 = arith.constant 0 : index
    %c0_19 = arith.constant 0 : index
    %38 = vector.load %arg5[%c0_16, %c0_17, %c0_18, %c0_19] : memref<1x1x2x256xf32, #tpu.memory_space<vmem>>, vector<1x1x1x256xf32>
    %39 = vector.shape_cast %38 : vector<1x1x1x256xf32> to vector<1x256xf32>
    %40 = vector.shape_cast %37 : vector<1x256xf32> to vector<1x1x1x256xf32>
    tpu.vector_store %arg5[%c0_16, %c0_17, %c0_18, %c0_19], %40 {strides = array<i32>} : memref<1x1x2x256xf32, #tpu.memory_space<vmem>>, vector<1x1x1x256xf32>,
    %c0_20 = arith.constant 0 : index
    %c0_21 = arith.constant 0 : index
    %c1 = arith.constant 1 : index
    %c0_22 = arith.constant 0 : index
    %41 = vector.load %arg5[%c0_20, %c0_21, %c1, %c0_22] : memref<1x1x2x256xf32, #tpu.memory_space<vmem>>, vector<1x1x1x256xf32>
    %42 = vector.shape_cast %41 : vector<1x1x1x256xf32> to vector<1x256xf32>
    %43 = arith.addf %42, %34 : vector<1x256xf32>
    %c0_23 = arith.constant 0 : index
    %c0_24 = arith.constant 0 : index
    %c1_25 = arith.constant 1 : index
    %c0_26 = arith.constant 0 : index
    %44 = vector.load %arg5[%c0_23, %c0_24, %c1_25, %c0_26] : memref<1x1x2x256xf32, #tpu.memory_space<vmem>>, vector<1x1x1x256xf32>
    %45 = vector.shape_cast %44 : vector<1x1x1x256xf32> to vector<1x256xf32>
    %46 = vector.shape_cast %43 : vector<1x256xf32> to vector<1x1x1x256xf32>
    tpu.vector_store %arg5[%c0_23, %c0_24, %c1_25, %c0_26], %46 {strides = array<i32>} : memref<1x1x2x256xf32, #tpu.memory_space<vmem>>, vector<1x1x1x256xf32>,
    return
  }
  func.func @transform_0(%arg0: i32, %arg1: i32, %arg2: i32) -> (i32, i32, i32) {
    %c1_i32 = arith.constant 1 : i32
    %0 = arith.muli %arg1, %c1_i32 : i32
    %1 = arith.addi %0, %arg2 : i32
    %c0_i32 = arith.constant 0 : i32
    %c0_i32_0 = arith.constant 0 : i32
    return %arg0, %c0_i32, %1 : i32, i32, i32
  }
  func.func @transform_1(%arg0: i32, %arg1: i32, %arg2: i32) -> (i32, i32, i32) {
    %c1_i32 = arith.constant 1 : i32
    %0 = arith.muli %arg1, %c1_i32 : i32
    %1 = arith.addi %0, %arg2 : i32
    %c0_i32 = arith.constant 0 : i32
    %c0_i32_0 = arith.constant 0 : i32
    return %arg0, %c0_i32, %1 : i32, i32, i32
  }
  func.func @transform_2(%arg0: i32, %arg1: i32, %arg2: i32) -> (i32, i32, i32, i32) {
    %c0_i32 = arith.constant 0 : i32
    %c0_i32_0 = arith.constant 0 : i32
    %c0_i32_1 = arith.constant 0 : i32
    return %arg0, %arg1, %c0_i32, %c0_i32_0 : i32, i32, i32, i32
  }
}

</mosaic_0001>

<bundles_post_ra>
// kernel: combined_focal_and_ui_loss.1
= control target key start
LH: loop header
LB: loop body
LE: loop exit
PB: predicated region body
PF: predicated region fallthrough
CT: control target
= control target key end

     0   :  { %s605_s9 = smov 0   ;;  %s607_s10 = smov 0   ;;  %s679_s0 = inlined_call_operand.vmem [shape: f32[2,12,256], index: 0, kind: input, shape index: {}]   ;;  %s680_s1 = inlined_call_operand.vmem [shape: s32[2,1,256], index: 1, kind: input, shape index: {}]   ;;  %s681_s2 = inlined_call_operand.vmem [shape: f32[2,1,2,256], index: 2, kind: output, shape index: {}]  }
   0x1   :  { %s609_s11 = smov 0  }
   0x2 LB: > { %s31_s12 = sadd.s32 1, %s582_s10  ;;  %p510_p0 = scmp.ge.s32.totalorder %s586_s11, 1  ;;  %s586_s11 = sphi %s609_s11, %s12_s11   ;;  %s582_s10 = sphi %s607_s10, %s683_s10   ;;  %s578_s9 = sphi %s605_s9, %s682_s9  }
   0x3   : > { %p33_p1 = scmp.ge.s32.totalorder %s31_s12, 2  ;;  %p164_p2 = scmp.lt.s32.totalorder %s586_s11, 3 }
   0x5   : > { %s685_s12 = smov (%p33_p1, %s31_s12), 0  ;;  %p165_p3 = pnand %p510_p0, %p164_p2 }
   0x6   : > { %p206_p4 = scmp.lt.s32.totalorder (!%p165_p3), %s578_s9, 1  ;;  %vm246_vm0 = vcmask (!%p165_p3), 1043456   ;;  %v588_v5 = vmov (!%p165_p3), 0.0   ;;  %v297_v16 = vlaneseq (!%p165_p3) }
   0x7   : > { %168 = sbr.rel (%p165_p3) target bundleno = 117 (0x75), region = 28 }
   0x8   : > { %v642_v21 = vshrl.u32 (!%p165_p3), %v297_v16, 7  ;;  %vm374_vm5 = vcmp.lt.s32.totalorder (!%p165_p3), %v297_v16, 256 }
   0xa   : > { %v302_v29 = vsub.s32 (!%p165_p3), 0, %v642_v21  ;;  %v306_v30 = vsub.s32 (!%p165_p3), 1, %v642_v21  ;;  %v299_v34 = vadd.s32 (!%p165_p3), 8, %v642_v21 }
   0xe   : > { %s687_s9 = smov (!%p206_p4, %s578_s9), 1 }
   0xf   : > { %s520_s13 = sshll.u32 %s687_s9, 5  ;;  %s521_s17 = sshll.u32 %s687_s9, 2 }
  0x10   : > { %s213_s16 = scalar_lea.vmem %s679_s0, %s520_s13  ;;  %s633_s20 = scalar_lea.vmem %s681_s2, %s521_s17 }
  0x11   : > { %v241_v0 = vld [vmem:[%s213_s16] sm:$0xff]  ;;  %v242_v1 = vld [vmem:[%s213_s16 + $0x8] sm:$0xff]  ;;  %v243_v2 = vld [vmem:[%s213_s16 + $0x10] sm:$0xf]  ;;  %240 = vst [vmem:[%s633_s20] sm:$0xf] %v588_v5  ;;  %s513_s21 = sshll.u32 %s687_s9, 1 }
  0x12   : > { %v244_v3 = vld [vmem:[%s213_s16 + $0x18] sm:$0xf]  ;;  %v247_v4 = vsel %vm246_vm0, %v243_v2, -inf  ;;  %s224_s24 = scalar_lea.vmem %s680_s1, %s513_s21 }
  0x13   : > { %v248_v6 = vmax.f32 %v241_v0, %v247_v4  ;;  %v255_v7 = vsel %vm246_vm0, %v244_v3, -inf  ;;  %v245_v31 = vld [vmem:[%s224_s24] sm:$0x3] }
  0x14   : > { %v256_v8 = vmax.f32 %v242_v1, %v255_v7  ;;  %v303_v35 = vrot.slane %v245_v31, %v302_v29  ;;  %v307_v36 = vrot.slane %v245_v31, %v306_v30 }
  0x15   : > { %v249_v9 = vrot.slane %v248_v6, 4 }
  0x16   : > { %v257_v10 = vrot.slane %v256_v8, 4  ;;  %vm310_vm1 = vcmp.eq.s32.totalorder %v299_v34, %v303_v35  ;;  %vm311_vm2 = vcmp.eq.s32.totalorder %v299_v34, %v307_v36  ;;  %vm308_vm3 = vcmp.eq.s32.totalorder %v642_v21, %v303_v35 }
  0x17   : > { %v250_v11 = vmax.f32 %v248_v6, %v249_v9  ;;  %v314_v37 = vsel %vm310_vm1, %v243_v2, 0.0  ;;  %vm309_vm4 = vcmp.eq.s32.totalorder %v642_v21, %v307_v36  ;;  %v315_v39 = vsel %vm311_vm2, %v244_v3, 0.0 }
  0x18   : > { %v258_v12 = vmax.f32 %v256_v8, %v257_v10  ;;  %v312_v42 = vsel %vm308_vm3, %v241_v0, 0.0  ;;  %v316_v43 = vsel %vm246_vm0, %v314_v37, 0.0  ;;  %v313_v46 = vsel %vm309_vm4, %v242_v1, 0.0 }
  0x19   : > { %v251_v13 = vrot.slane %v250_v11, 2  ;;  %v324_v47 = vsel %vm246_vm0, %v315_v39, 0.0  ;;  %v317_v51 = vadd.f32 %v316_v43, %v312_v42 }
  0x1a   : > { %v259_v14 = vrot.slane %v258_v12, 2  ;;  %v325_v53 = vadd.f32 %v324_v47, %v313_v46 }
  0x1b   : > { %v252_v15 = vmax.f32 %v250_v11, %v251_v13  ;;  %v318_v57 = vrot.slane %v317_v51, 4 }
  0x1c   : > { %v260_v17 = vmax.f32 %v258_v12, %v259_v14  ;;  %v326_v59 = vrot.slane %v325_v53, 4 }
  0x1d   : > { %v253_v18 = vrot.slane %v252_v15, 1  ;;  %v319_v63 = vadd.f32 %v318_v57, %v317_v51  ;;  %v352_v51 = vld [vmem:[%s633_s20] ss:$2 sm:$0x3] }
  0x1e   : > { %v261_v19 = vrot.slane %v260_v17, 1 }
  0x1f   : > { %v639_v20 = vmax.f32 %v252_v15, %v253_v18  ;;  %v320_v5 = vrot.slane %v319_v63, 2 }
  0x20   : > { %v644_v22 = vmax.f32 %v260_v17, %v261_v19 }
  0x21   : > { %v263_v23 = vsub.f32 %v241_v0, %v639_v20  ;;  %v265_v24 = vsub.f32 %v243_v2, %v639_v20  ;;  %v321_v7 = vadd.f32 %v320_v5, %v319_v63 }
  0x22   : > { %v264_v25 = vsub.f32 %v242_v1, %v644_v22  ;;  %v266_v26 = vsub.f32 %v244_v3, %v644_v22  ;;  %v327_v1 = vadd.f32 %v326_v59, %v325_v53 }
  0x23   : > { %v267_v27 = vmul.f32 1.442695, %v263_v23  ;;  %v271_v28 = vmul.f32 1.442695, %v265_v24  ;;  %v322_v9 = vrot.slane %v321_v7, 1 }
  0x24   : > { %v269_v32 = vmul.f32 1.442695, %v264_v25  ;;  %v273_v33 = vmul.f32 1.442695, %v266_v26  ;;  %v328_v6 = vrot.slane %v327_v1, 2 }
  0x25   : > { %548 = vpow2.f32 %v267_v27  ;;  %v323_v14 = vadd.f32 %v322_v9, %v321_v7  ;;  %v589_v27 = vmov 1966171168  }
  0x26   : > { %550 = vpow2.f32 %v269_v32  ;;  %v329_v8 = vadd.f32 %v328_v6, %v327_v1 }
  0x27   : > { %552 = vpow2.f32 %v271_v28  ;;  %v357_v28 = vunpack.c.l.s4 %v589_v27 }
  0x28   : > { %554 = vpow2.f32 %v273_v33  ;;  %v330_v10 = vrot.slane %v329_v8, 1 }
  0x29   : > { %v358_v30 = vunpack.c.0.s8 %v357_v28 }
  0x2a   : > { %v331_v17 = vadd.f32 %v330_v10, %v329_v8 }
  0x2f   : > { %v549_v38 = vpop.eup %548 }
  0x30   : > { %v551_v40 = vpop.eup %550 }
  0x31   : > { %v553_v41 = vpop.eup %552 }
  0x32   : > { %v555_v44 = vpop.eup %554  ;;  %v275_v45 = vsel %vm246_vm0, %v553_v41, 0.0 }
  0x33   : > { %v276_v48 = vadd.f32 %v549_v38, %v275_v45  ;;  %v283_v49 = vsel %vm246_vm0, %v555_v44, 0.0  ;;  %v516_v44 = vld [vmem:[%s633_s20 + $0x1] ss:$2 sm:$0x3] }
  0x34   : > { %v284_v50 = vadd.f32 %v551_v40, %v283_v49 }
  0x35   : > { %v277_v52 = vrot.slane %v276_v48, 4 }
  0x36   : > { %v285_v54 = vrot.slane %v284_v50, 4 }
  0x37   : > { %v278_v55 = vadd.f32 %v277_v52, %v276_v48 }
  0x38   : > { %v286_v56 = vadd.f32 %v285_v54, %v284_v50 }
  0x39   : > { %v279_v58 = vrot.slane %v278_v55, 2 }
  0x3a   : > { %v287_v60 = vrot.slane %v286_v56, 2 }
  0x3b   : > { %v280_v61 = vadd.f32 %v279_v58, %v278_v55 }
  0x3c   : > { %v288_v62 = vadd.f32 %v287_v60, %v286_v56 }
  0x3d   : > { %v281_v0 = vrot.slane %v280_v61, 1 }
  0x3e   : > { %v289_v2 = vrot.slane %v288_v62, 1 }
  0x3f   : > { %v282_v3 = vadd.f32 %v281_v0, %v280_v61 }
  0x40   : > { %v290_v4 = vadd.f32 %v289_v2, %v288_v62 }
  0x41   : > { %556 = vlog2.f32 %v282_v3 }
  0x42   : > { %558 = vlog2.f32 %v290_v4 }
  0x4b   : > { %v557_v11 = vpop.eup %556 }
  0x4c   : > { %v559_v12 = vpop.eup %558  ;;  %v292_v13 = vmul.f32 0.6931472, %v557_v11 }
  0x4d   : > { %v294_v15 = vmul.f32 0.6931472, %v559_v12 }
  0x4e   : > { %v295_v18 = vadd.f32 %v292_v13, %v639_v20  ;;  %v361_v20 = vsub.s32 %v358_v30, %v642_v21 }
  0x4f   : > { %v296_v19 = vadd.f32 %v294_v15, %v644_v22 }
  0x50   : > { %v332_v23 = vsub.f32 %v323_v14, %v295_v18 }
  0x51   : > { %v333_v24 = vsub.f32 %v331_v17, %v296_v19 }
  0x52   : > { %v334_v25 = vmul.f32 1.442695, %v332_v23 }
  0x53   : > { %v336_v26 = vmul.f32 1.442695, %v333_v24 }
  0x54   : > { %560 = vpow2.f32 %v334_v25 }
  0x55   : > { %562 = vpow2.f32 %v336_v26 }
  0x5e   : > { %v561_v29 = vpop.eup %560 }
  0x5f   : > { %v563_v31 = vpop.eup %562  ;;  %v338_v32 = vsub.f32 1.0, %v561_v29 }
  0x60   : > { %v339_v33 = vsub.f32 1.0, %v563_v31 }
  0x61   : > { %v340_v34 = vmul.f32 %v338_v32, %v338_v32  ;;  %v350_v35 = vmul.f32 2.0, %v338_v32 }
  0x62   : > { %v341_v36 = vmul.f32 %v339_v33, %v339_v33  ;;  %v351_v22 = vmul.f32 2.0, %v339_v33 }
  0x63   : > { %v342_v37 = vmul.f32 %v340_v34, %v340_v34 }
  0x64   : > { %v343_v38 = vmul.f32 %v341_v36, %v341_v36  ;;  %v381_v39 = vcombine.low %v350_v35, %v351_v22 }
  0x65   : > { %v344_v40 = vmul.f32 %v342_v37, %v338_v32 }
  0x66   : > { %v345_v41 = vmul.f32 %v343_v38, %v339_v33  ;;  %v388_v42 = vrot.slane %v381_v39, %v361_v20 }
  0x67   : > { %v346_v43 = vsub.f32 0.0, %v344_v40 }
  0x68   : > { %v347_v45 = vsub.f32 0.0, %v345_v41  ;;  %v395_v46 = vrot.slane %v388_v42, %v361_v20 }
  0x69   : > { %v348_v47 = vmul.f32 %v346_v43, %v332_v23 }
  0x6a   : > { %v349_v48 = vmul.f32 %v347_v45, %v333_v24  ;;  %v397_v49 = vadd.f32 %v516_v44, %v395_v46 }
  0x6c   : > { %v355_v21 = vcombine.low %v348_v47, %v349_v48  ;;  %517 = vst.msk [vmem:[%s633_s20 + $0x1] ss:$2 sm:$0x3] %vm374_vm5, %v397_v49 }
  0x6e   : > { %v362_v50 = vrot.slane %v355_v21, %v361_v20 }
  0x70   : > { %v369_v52 = vrot.slane %v362_v50, %v361_v20 }
  0x72   : > { %v371_v53 = vadd.f32 %v369_v52, %v352_v51 }
  0x74   : > { %376 = vst.msk [vmem:[%s633_s20] ss:$2 sm:$0x3] %vm374_vm5, %v371_v53 }
  0x75 PF: > { %s12_s11 = sadd.s32 1, %s586_s11   ;;  %s682_s9 = smov %s582_s10 }
  0x76   : > { %p9_p5 = scmp.ge.s32.totalorder %s12_s11, 4   ;;  %s683_s10 = smov %s685_s12 }
  0x78   :  { %11 = sbr.rel (!%p9_p5) target bundleno = 2 (0x2), region = 66 }

</bundles_post_ra>
